<compile_context>
chip_gen: v5e
topology: v5e:2x2
jax: 0.10.0
libtpu: 0.0.40
codegen_flags: <defaults>
</compile_context>

<pallas_src>
from enum import Enum

import jax
import jax.numpy as jnp
from jax import lax
from jax.experimental import pallas as pl
from jax.experimental.pallas import tpu as pltpu


class CenternetHelperOperations(Enum):
    CENTERNET_NMS = 0
    GATHER_FEAT = 1
    TOPK = 2
    PREPARE_OUTPUT = 3


# PyTorch hard-codes in1[:, 0:5, 0:100] for the TOPK path.
_TOPK_ROWS = 5
_TOPK_COLS = 100


# ----------------------------------------------------------------------------
# GATHER_FEAT:  out = in1[:, 0:in2.shape[1], :]
# Contiguous slice-copy -> handled by XLA directly (perf review: a Pallas copy
# kernel cannot beat the native copy and adds launch/grid overhead).
# ----------------------------------------------------------------------------
def _gather_feat(in1, in2):
    select = in2.shape[1]
    return in1[:, :select, :]


# ----------------------------------------------------------------------------
# TOPK:  in1[:, 0:5, 0:100].squeeze().mean(2)   (standard case: batch > 1)
# ----------------------------------------------------------------------------
def _topk_mean_kernel(in_ref, out_ref):
    # in_ref: (TB, Cb, Kb) aligned tile (Cb <= 8, Kb <= 128); out_ref: (TB, Cb)
    x = in_ref[...].astype(jnp.float32)                       # f32 accumulation
    lanes = lax.broadcasted_iota(jnp.int32, x.shape, dimension=2)
    masked = jnp.where(lanes < _TOPK_COLS, x, 0.0)            # mask lanes >= 100
    sums = jnp.sum(masked, axis=-1)                           # XLU lane-reduce
    out_ref[...] = (sums * (1.0 / _TOPK_COLS)).astype(out_ref.dtype)


def _topk(in1):
    B, C, K = in1.shape
    if B <= 1:
        # PyTorch: .squeeze() drops the batch dim and .mean(2) then raises.
        raise ValueError("TOPK requires batch > 1 (matches PyTorch behavior).")
    if C < _TOPK_ROWS or K < _TOPK_COLS:
        raise ValueError(
            f"TOPK requires C >= {_TOPK_ROWS} and K >= {_TOPK_COLS}, "
            f"got C={C}, K={K}.")

    # Minimal aligned tile: one vreg worth of rows/lanes (or the full dim when
    # smaller) -- never DMA the whole (C, K) slab.
    Cb = 8 if C >= 8 else C          # sublane quantum or full dim
    Kb = 128 if K >= 128 else K      # lane quantum or full dim
    # Fold batches into the block to amortize per-grid-step overhead.
    TB = B if B <= 8 else 8
    R = Cb                           # rows written per batch (wrapper slices :5)

    itemsize = jnp.dtype(in1.dtype).itemsize
    out_full = pl.pallas_call(
        _topk_mean_kernel,
        out_shape=jax.ShapeDtypeStruct((B, R), in1.dtype),
        grid=(pl.cdiv(B, TB),),
        in_specs=[pl.BlockSpec((TB, Cb, Kb), lambda i: (i, 0, 0))],
        out_specs=pl.BlockSpec((TB, R), lambda i: (i, 0)),
        compiler_params=pltpu.CompilerParams(
            dimension_semantics=("parallel",)),
        cost_estimate=pl.CostEstimate(
            flops=int(B * Cb * Kb + B * Cb),
            transcendentals=0,
            bytes_accessed=int(B * Cb * Kb * itemsize + B * R * itemsize),
        ),
    )(in1)
    # Batch > 1 => PyTorch .squeeze() is a no-op and the result is (B, 5).
    return out_full[:, :_TOPK_ROWS]


# ----------------------------------------------------------------------------
# PREPARE_OUTPUT:  concat([in1, in2], axis=2)
# ----------------------------------------------------------------------------
def _concat_last_dim_kernel(a_ref, b_ref, out_ref):
    # a_ref: (1, TN, C1) ; b_ref: (1, TN, C2) ; out_ref: (1, TN, C1 + C2)
    c1 = a_ref.shape[-1]             # static, multiple of 128 (guarded below)
    out_ref[:, :, :c1] = a_ref[...]
    out_ref[:, :, c1:] = b_ref[...]


def _prepare_output(in1, in2):
    B, N, C1 = in1.shape
    B2, N2, C2 = in2.shape
    assert (B, N) == (B2, N2), "in1/in2 must match on batch and row dims"

    if C1 % 128 != 0:
        # Mid-lane second store would make the kernel XLU/VPU bound; let XLA
        # handle the unaligned concat instead (perf review guidance).
        return jnp.concatenate([in1, in2], axis=2)

    itemsize = jnp.dtype(in1.dtype).itemsize
    # Per output row we move C1 + C2 input elems + (C1 + C2) output elems.
    bytes_per_row = 2 * (C1 + C2) * itemsize
    # Keep the double-buffered per-step footprint under ~8 MiB (v5e-safe).
    target_bytes = 8 * 1024 * 1024
    tn_cap = max(8, target_bytes // (2 * bytes_per_row))
    if tn_cap >= N:
        TN = N                                   # full row dim (always legal)
    else:
        TN = max(8, min(2048, (tn_cap // 8) * 8))  # multiple of 8, <= 2048

    # Double-buffered per-step VMEM footprint for the 2 inputs + 1 output.
    footprint = 2 * TN * bytes_per_row
    vmem_limit = int(min(max(2 * footprint, 32 * 1024 * 1024),
                         100 * 1024 * 1024))

    return pl.pallas_call(
        _concat_last_dim_kernel,
        out_shape=jax.ShapeDtypeStruct((B, N, C1 + C2), in1.dtype),
        grid=(B, pl.cdiv(N, TN)),
        in_specs=[
            pl.BlockSpec((1, TN, C1), lambda b, r: (b, r, 0)),
            pl.BlockSpec((1, TN, C2), lambda b, r: (b, r, 0)),
        ],
        out_specs=pl.BlockSpec((1, TN, C1 + C2), lambda b, r: (b, r, 0)),
        compiler_params=pltpu.CompilerParams(
            dimension_semantics=("parallel", "parallel"),
            vmem_limit_bytes=vmem_limit,
        ),
        cost_estimate=pl.CostEstimate(
            flops=0,
            transcendentals=0,
            bytes_accessed=int(2 * B * N * (C1 + C2) * itemsize),
        ),
    )(in1, in2)


# ----------------------------------------------------------------------------
# Module forward
# ----------------------------------------------------------------------------
def centernet_helper_forward(in1, in2, operation, attr1=1, attr2=1, attr3=1):
    """Mirrors CenternetHelper.forward (runtime semantics, not ONNX export).

    `operation` must be a static Python int (or CenternetHelperOperations);
    it selects a code path at trace time and may not be a traced value.
    """
    del attr1, attr2, attr3  # only used by the ONNX symbolic, not the forward
    if isinstance(operation, CenternetHelperOperations):
        operation = operation.value
    operation = int(operation)

    if operation == CenternetHelperOperations.GATHER_FEAT.value:
        return _gather_feat(in1, in2)
    if operation == CenternetHelperOperations.TOPK.value:
        return _topk(in1)
    if operation == CenternetHelperOperations.PREPARE_OUTPUT.value:
        return _prepare_output(in1, in2)
    # CENTERNET_NMS / any other op: pure identity -- no kernel, no HBM traffic.
    return in1


if __name__ == "__main__":
    key = jax.random.PRNGKey(0)
    k1, k2, k3, k4, k5, k6, k7, k8 = jax.random.split(key, 8)

    # --- GATHER_FEAT: in1 (B, N, C), in2 (B, select, C) -> in1[:, :select, :]
    B, N, C = 2, 16, 128
    select = 8
    g_in1 = jax.random.normal(k1, (B, N, C), dtype=jnp.float32)
    g_in2 = jax.random.normal(k2, (B, select, C), dtype=jnp.float32)
    g_out = centernet_helper_forward(
        g_in1, g_in2, CenternetHelperOperations.GATHER_FEAT.value)
    g_out = jax.block_until_ready(g_out)
    assert g_out.shape == (B, select, C)
    assert bool(jnp.array_equal(g_out, g_in1[:, :select, :]))

    # --- TOPK: in1 (B, C, K), C>=5, K>=100, B>1 -> (B, 5)
    t_in1 = jax.random.normal(k3, (2, 8, 128), dtype=jnp.float32)
    t_in2 = jnp.zeros((1, 1), dtype=jnp.float32)  # unused by TOPK
    t_out = centernet_helper_forward(
        t_in1, t_in2, CenternetHelperOperations.TOPK.value)
    t_out = jax.block_until_ready(t_out)
    t_ref = jnp.mean(t_in1[:, 0:5, 0:100], axis=2)
    assert t_out.shape == t_ref.shape
    assert bool(jnp.allclose(t_out, t_ref, rtol=1e-5, atol=1e-5))

    # --- PREPARE_OUTPUT (lane-aligned C1 -> Pallas kernel): concat on axis 2
    p_in1 = jax.random.normal(k4, (2, 16, 128), dtype=jnp.float32)
    p_in2 = jax.random.normal(k5, (2, 16, 128), dtype=jnp.float32)
    p_out = centernet_helper_forward(
        p_in1, p_in2, CenternetHelperOperations.PREPARE_OUTPUT.value)
    p_out = jax.block_until_ready(p_out)
    assert bool(jnp.array_equal(p_out, jnp.concatenate([p_in1, p_in2], axis=2)))

    # --- PREPARE_OUTPUT (C1 % 128 != 0 -> XLA fallback path)
    q_in1 = jax.random.normal(k6, (2, 16, 64), dtype=jnp.float32)
    q_in2 = jax.random.normal(k7, (2, 16, 64), dtype=jnp.float32)
    q_out = centernet_helper_forward(
        q_in1, q_in2, CenternetHelperOperations.PREPARE_OUTPUT.value)
    q_out = jax.block_until_ready(q_out)
    assert bool(jnp.array_equal(q_out, jnp.concatenate([q_in1, q_in2], axis=2)))

    # --- CENTERNET_NMS (default path): pure identity, no kernel launched.
    n_in1 = jax.random.normal(k8, (2, 16, 128), dtype=jnp.float32)
    n_out = centernet_helper_forward(
        n_in1, g_in2, CenternetHelperOperations.CENTERNET_NMS.value)
    n_out = jax.block_until_ready(n_out)
    assert bool(jnp.array_equal(n_out, n_in1))

    print("KERNEL_OK")
</pallas_src>

<mosaic_0001>
module attributes {stable_mosaic.version = 11 : i64} {
  func.func @_topk_mean_kernel(%arg0: i32, %arg1: memref<2x8x128xf32, #tpu.memory_space<vmem>>, %arg2: memref<2x8xf32, #tpu.memory_space<vmem>>) attributes {dimension_semantics = [#tpu.dimension_semantics<parallel>], iteration_bounds = array<i64: 1>, scalar_prefetch = 0 : i64, scratch_operands = 0 : i64, tpu.core_type = #tpu.core_type<tc>, window_params = [{transform_indices = @transform_0, window_bounds = array<i64: 2, 8, 128>}, {transform_indices = @transform_1, window_bounds = array<i64: 2, 8>}]} {
    %c0 = arith.constant 0 : index
    %c0_0 = arith.constant 0 : index
    %c0_1 = arith.constant 0 : index
    %0 = vector.load %arg1[%c0, %c0_0, %c0_1] : memref<2x8x128xf32, #tpu.memory_space<vmem>>, vector<2x8x128xf32>
    %1 = tpu.iota {dimensions = array<i32: 2>} : vector<2x8x128xi32>
    %c100_i32 = arith.constant 100 : i32
    %2 = vector.broadcast %c100_i32 : i32 to vector<2x8x128xi32>
    %3 = arith.cmpi slt, %1, %2 : vector<2x8x128xi32>
    %cst = arith.constant 0.000000e+00 : f32
    %4 = vector.broadcast %cst : f32 to vector<2x8x128xf32>
    %5 = arith.select %3, %0, %4 : vector<2x8x128xi1>, vector<2x8x128xf32>
    %cst_2 = arith.constant dense<0.000000e+00> : vector<2x8xf32>
    %6 = vector.multi_reduction <add>, %5, %cst_2 [2] : vector<2x8x128xf32> to vector<2x8xf32>
    %cst_3 = arith.constant 0.00999999977 : f32
    %7 = vector.broadcast %cst_3 : f32 to vector<2x8xf32>
    %8 = arith.mulf %6, %7 : vector<2x8xf32>
    %c0_4 = arith.constant 0 : index
    %c0_5 = arith.constant 0 : index
    %9 = vector.load %arg2[%c0_4, %c0_5] : memref<2x8xf32, #tpu.memory_space<vmem>>, vector<2x8xf32>
    tpu.vector_store %arg2[%c0_4, %c0_5], %8 {strides = array<i32>} : memref<2x8xf32, #tpu.memory_space<vmem>>, vector<2x8xf32>,
    return
  }
  func.func @transform_0(%arg0: i32) -> (i32, i32, i32) {
    %c0_i32 = arith.constant 0 : i32
    %c0_i32_0 = arith.constant 0 : i32
    %c0_i32_1 = arith.constant 0 : i32
    return %arg0, %c0_i32, %c0_i32_0 : i32, i32, i32
  }
  func.func @transform_1(%arg0: i32) -> (i32, i32) {
    %c0_i32 = arith.constant 0 : i32
    %c0_i32_0 = arith.constant 0 : i32
    return %arg0, %c0_i32 : i32, i32
  }
}

</mosaic_0001>

<bundles_post_ra>
// kernel: tpu_custom_call.1
= control target key start
LH: loop header
LB: loop body
LE: loop exit
PB: predicated region body
PF: predicated region fallthrough
CT: control target
= control target key end

     0   :  { %6 = vsyncpa [#allocation3], 0  ;;  %s140_s0 = inlined_call_operand.hbm [shape: f32[2,8,128], index: 0, kind: input, shape index: {}]   ;;  %s141_s1 = inlined_call_operand.hbm [shape: f32[2,8], index: 1, kind: output, shape index: {}]  }
   0x1   :  { %7 = vsyncpa [#allocation4], 0  ;;  %s12_s8 = sshll.u32 %s140_s0, 4  ;;  %s120_s9 = smov [#allocation2]   ;;  %s13_s8 = int_to_ptr.hbm [resolvable:$true] %s12_s8 }
   0x2   :  { %s14_s10 = sshll.u32 %s120_s9, 4  ;;  %s121_s11 = smov 128   ;;  %s15_s10 = int_to_ptr.vmem [resolvable:$true] %s14_s10 }
   0x3   :  { %s122_s12 = smov 8  }
   0x4   :  { %20 = dma.hbm_to_vmem [thread:$0]  %s13_s8, 256, %s15_s10, [#allocation3], %s121_s11, %s121_s11, %s122_s12  }
   0x5   :  { %116 = dma.done.wait [#allocation3], 256  }
   0x6   :  { %117 = vsyncadd [#allocation3], 4294967040  ;;  %v27_v0 = vlaneseq  ;;  %v25_v2 = vld [vmem:[#allocation2] sm:$0xff]  ;;  %v26_v4 = vld [vmem:[#allocation2 + $0x8] sm:$0xff]  ;;  %s123_s0 = smov [#allocation5]   ;;  %s54_s16 = sshll.u32 %s141_s1, 4  ;;  %s55_s16 = int_to_ptr.hbm [resolvable:$true] %s54_s16 }
   0x7   :  { %s52_s13 = sshll.u32 %s123_s0, 4  ;;  %vm42_vm1 = vcmask 1041409   ;;  %vm45_vm2 = vcmask 58368   ;;  %s53_s13 = int_to_ptr.vmem [resolvable:$true] %s52_s13 }
   0x8   :  { %v28_v1 = vand.u32 127, %v27_v0 }
   0xa   :  { %vm29_vm0 = vcmp.lt.s32.totalorder %v28_v1, 100 }
   0xb   :  { %v30_v3 = vsel %vm29_vm0, %v25_v2, 0.0  ;;  %v31_v5 = vsel %vm29_vm0, %v26_v4, 0.0 }
   0xc   :  { %32 = vadd.xlane.f32.xlu0 %v30_v3 }
  0x14   :  { %34 = vadd.xlane.f32.xlu0 %v31_v5 }
  0x7f   :  { %v33_v6 = vpop.xlane.xlu0 %32 }
  0x80   :  { %v36_v7 = vmul.f32 0.01, %v33_v6 }
  0x82   :  { %v40_v10 = vperm.slane %v36_v7, %v28_v1 }
  0x87   :  { %v35_v8 = vpop.xlane.xlu0 %34 }
  0x88   :  { %v37_v9 = vmul.f32 0.01, %v35_v8 }
  0x8a   :  { %v41_v11 = vperm.slane %v37_v9, %v28_v1 }
  0x8c   :  { %v43_v12 = vsel %vm42_vm1, %v41_v11, %v40_v10 }
  0x8d   :  { %46 = vst.msk [vmem:[#allocation5] sm:$0x3] %vm45_vm2, %v43_v12 }
  0x8e   :  { %57 = dma.vmem_to_hbm [thread:$0]  %s53_s13, 32, %s55_s16, [#allocation4]  }
  0x8f   :  { %118 = dma.done.wait [#allocation4], 32  }
  0x90   :  { %119 = vsyncadd [#allocation4], 4294967264 }
  0x91   :  { %62 = vsyncpa [#allocation3], 1 }
  0x92   :  { %63 = vsyncpa [#allocation4], 1 }

</bundles_post_ra>
